<compile_context>
chip_gen: v5e
topology: v5e:2x2
jax: 0.10.0
libtpu: 0.0.40
codegen_flags: <defaults>
</compile_context>

<pallas_src>
import functools
import math

import jax
import jax.numpy as jnp
from jax.experimental import pallas as pl
from jax.experimental.pallas import tpu as pltpu


def _round_up(x, m):
    return (x + m - 1) // m * m


# --------------------------------------------------------------------------- #
# Kernel 1: feature projection  hw = (H @ W) * norm   (computed ONCE, not per i)
# --------------------------------------------------------------------------- #
def project_kernel(h_ref, w_ref, norm_ref, o_ref):
    # (tm_p, Din) @ (Din, Dp) in f32 on the MXU (tiny vs. the N^2 aggregation).
    hw = jnp.dot(h_ref[...], w_ref[...], preferred_element_type=jnp.float32)
    # Pre-aggregation norm scaling in f32, then emit bf16 for the MXU consumer.
    o_ref[...] = (hw * norm_ref[...]).astype(o_ref.dtype)


# --------------------------------------------------------------------------- #
# Kernel 2: aggregation  out = relu((A @ hw) * norm)
#   A tile is int8 (binary adjacency) -> cast to bf16 on-chip.
#   Output block index is constant across k, so o_ref is the accumulator.
# --------------------------------------------------------------------------- #
def aggregate_kernel(a_ref, hw_ref, norm_ref, o_ref):
    k = pl.program_id(1)
    tk = a_ref.shape[1]

    @pl.when(k == 0)
    def _init():
        o_ref[...] = jnp.zeros_like(o_ref)

    # Slice the k-chunk out of a VMEM-resident HW, or use the streamed k-tile.
    if hw_ref.shape[0] == tk:
        hw = hw_ref[...]
    else:
        start = pl.multiple_of(k * tk, 128)
        hw = hw_ref[pl.ds(start, tk), :]

    # int8 (HBM-cheap) -> f32 -> bf16 on the VPU; MXU runs bf16 x bf16 -> f32.
    a_bf16 = a_ref[...].astype(jnp.float32).astype(jnp.bfloat16)
    o_ref[...] += jnp.dot(a_bf16, hw, preferred_element_type=jnp.float32)

    @pl.when(k == pl.num_programs(1) - 1)
    def _finalize():
        # Post-aggregation norm scaling (exact, f32) + ReLU, in place.
        o_ref[...] = jnp.maximum(o_ref[...] * norm_ref[...], 0.0)


# --------------------------------------------------------------------------- #
# Wrapper
# --------------------------------------------------------------------------- #
@functools.partial(jax.jit, static_argnames=("tile",))
def gcn_layer(adj, norm, h, weight, *, tile=1024):
    """relu((A @ ((H @ W) * norm)) * norm).

    adj:    (N, N) binary adjacency (A[dst, src] = 1 for edge src->dst)
    norm:   (N, 1) per-node normalization (e.g. 1/sqrt(deg))
    h:      (N, Din) node features
    weight: (Din, Dout)
    """
    n, din = h.shape
    dout = weight.shape[1]
    dp = _round_up(dout, 128)                 # lane-dense output width
    assert tile % 128 == 0

    # Row/col padding: 128-aligned (int8 (32,128) / bf16 (16,128) native tiles,
    # unmasked full-vreg loads/stores).
    if n <= tile:
        n_pad = _round_up(n, 128)
    else:
        n_pad = _round_up(n, tile)

    tk = min(n_pad, tile)
    tm = tk
    if n_pad // tm < 2 and n_pad >= 256:
        tm = n_pad // 2                       # >=2 row tiles so v7x's 2nd TC is used

    # --- pad / cast inputs (once per call; A_hat is NOT pre-scaled by norm) ---
    a_i8 = jnp.pad(adj, ((0, n_pad - n), (0, n_pad - n))).astype(jnp.int8)
    h_p = jnp.pad(h, ((0, n_pad - n), (0, 0))).astype(jnp.float32)
    w_p = jnp.pad(weight, ((0, 0), (0, dp - dout))).astype(jnp.float32)
    norm_p = jnp.pad(jnp.reshape(norm, (n, 1)), ((0, n_pad - n), (0, 0))).astype(
        jnp.float32
    )

    # --- projection pass: hw = (H @ W) * norm, bf16 ---
    tm_p = min(n_pad, tile)
    proj_vmem = (
        tm_p * din * 4 * 2        # H tile (double-buffered)
        + din * dp * 4 * 2        # W (resident; counted with 2 bufs for safety)
        + tm_p * 128 * 4 * 2      # norm tile (lane-padded)
        + tm_p * dp * 2 * 2       # bf16 output tile
    )
    proj_vmem = min(max(int(proj_vmem * 1.25) + (2 << 20), 8 << 20), 56 << 20)

    hw = pl.pallas_call(
        project_kernel,
        out_shape=jax.ShapeDtypeStruct((n_pad, dp), jnp.bfloat16),
        grid=(n_pad // tm_p,),
        in_specs=[
            pl.BlockSpec((tm_p, din), lambda i: (i, 0)),   # H rows
            pl.BlockSpec((din, dp), lambda i: (0, 0)),     # W (resident)
            pl.BlockSpec((tm_p, 1), lambda i: (i, 0)),     # norm rows
        ],
        out_specs=pl.BlockSpec((tm_p, dp), lambda i: (i, 0)),
        compiler_params=pltpu.CompilerParams(
            dimension_semantics=("parallel",),
            vmem_limit_bytes=proj_vmem,
        ),
    )(h_p, w_p, norm_p)

    # --- aggregation pass: out = relu((A @ hw) * norm) ---
    # Keep HW fully VMEM-resident when it fits (conservative 24 MiB incl. a
    # second buffer copy, safe even on v7x's 64 MiB physical VMEM).
    hw_resident = n_pad * dp * 2 * 2 <= 24 * 1024 * 1024
    if hw_resident:
        hw_spec = pl.BlockSpec((n_pad, dp), lambda i, k: (0, 0))
        hw_bytes = n_pad * dp * 2 * 2
    else:
        hw_spec = pl.BlockSpec((tk, dp), lambda i, k: (k, 0))
        hw_bytes = tk * dp * 2 * 2

    agg_vmem = (
        tm * tk * 1 * 2           # int8 A tile (double-buffered)
        + hw_bytes                # projected features
        + tm * 128 * 4 * 2        # norm tile (lane-padded)
        + tm * dp * 4 * 2         # f32 output tile (also the accumulator)
    )
    agg_vmem = min(max(int(agg_vmem * 1.25) + (2 << 20), 8 << 20), 56 << 20)

    out = pl.pallas_call(
        aggregate_kernel,
        out_shape=jax.ShapeDtypeStruct((n_pad, dp), jnp.float32),
        grid=(n_pad // tm, n_pad // tk),
        in_specs=[
            pl.BlockSpec((tm, tk), lambda i, k: (i, k)),   # A tile (int8)
            hw_spec,                                       # projected features
            pl.BlockSpec((tm, 1), lambda i, k: (i, 0)),    # norm for row tile i
        ],
        out_specs=pl.BlockSpec((tm, dp), lambda i, k: (i, 0)),
        compiler_params=pltpu.CompilerParams(
            dimension_semantics=("parallel", "arbitrary"),
            vmem_limit_bytes=agg_vmem,
        ),
    )(a_i8, hw, norm_p)

    return out[:n, :dout]


if __name__ == "__main__":
    key = jax.random.PRNGKey(0)
    k_h, k_w, k_a = jax.random.split(key, 3)

    # Small shapes consistent with the module: N nodes, input_dim -> output_dim.
    N, INPUT_DIM, OUTPUT_DIM = 8, 32, 16

    # Node features.
    h = jax.random.normal(k_h, (N, INPUT_DIM), dtype=jnp.float32)

    # Deterministic weight init matching reset_parameters():
    # uniform(-stdv, stdv), stdv = 1/sqrt(output_dim).
    stdv = 1.0 / math.sqrt(OUTPUT_DIM)
    weight = jax.random.uniform(
        k_w, (INPUT_DIM, OUTPUT_DIM), minval=-stdv, maxval=stdv, dtype=jnp.float32
    )

    # Random binary graph adjacency (A[dst, src] = 1 if edge src -> dst) + self loops.
    adj = (jax.random.uniform(k_a, (N, N)) < 0.4).astype(jnp.float32)
    adj = jnp.maximum(adj, jnp.eye(N, dtype=jnp.float32))

    # Per-node norm = 1/sqrt(in-degree), shape (N, 1)  (== g.ndata['norm']).
    deg = jnp.sum(adj, axis=1, keepdims=True)
    norm = 1.0 / jnp.sqrt(deg)

    # TODO(synk): dropout branch (nn.Dropout) omitted since dropout=0 (falsy) here;
    # a training-mode variant would use pltpu.prng_seed + pltpu.stateful_bernoulli.

    out = jax.block_until_ready(gcn_layer(adj, norm, h, weight))

    # Pure-JAX f32 reference of the original module's forward.
    ref = jnp.maximum((adj @ ((h @ weight) * norm)) * norm, 0.0)

    assert out.shape == (N, OUTPUT_DIM)
    # Only the projected features pass through bf16 (A is exact binary int8 and
    # both norm scalings are applied in f32), so the tolerance can be tight.
    assert jnp.allclose(out, ref, atol=2e-2, rtol=2e-2), float(
        jnp.max(jnp.abs(out - ref))
    )
    print("KERNEL_OK")
</pallas_src>

<mosaic_0001>
module attributes {stable_mosaic.version = 11 : i64} {
  func.func @aggregate_kernel(%arg0: i32, %arg1: i32, %arg2: memref<128x128xi8, #tpu.memory_space<vmem>>, %arg3: memref<128x128xbf16, #tpu.memory_space<vmem>>, %arg4: memref<128x1xf32, #tpu.memory_space<vmem>>, %arg5: memref<128x128xf32, #tpu.memory_space<vmem>>) attributes {dimension_semantics = [#tpu.dimension_semantics<parallel>, #tpu.dimension_semantics<arbitrary>], iteration_bounds = array<i64: 1, 1>, scalar_prefetch = 0 : i64, scratch_operands = 0 : i64, tpu.core_type = #tpu.core_type<tc>, window_params = [{transform_indices = @transform_0, window_bounds = array<i64: 128, 128>}, {pipeline_mode = #tpu.pipeline_mode<synchronous>, transform_indices = @transform_1, window_bounds = array<i64: 128, 128>}, {transform_indices = @transform_2, window_bounds = array<i64: 128, 1>}, {transform_indices = @transform_3, window_bounds = array<i64: 128, 128>}]} {
    %c0_i32 = arith.constant 0 : i32
    %0 = arith.cmpi eq, %arg1, %c0_i32 : i32
    %1 = arith.extui %0 : i1 to i32
    %c0_i32_0 = arith.constant 0 : i32
    %2 = arith.cmpi ne, %1, %c0_i32_0 : i32
    scf.if %2 {
      %cst_10 = arith.constant 0.000000e+00 : f32
      %14 = vector.broadcast %cst_10 : f32 to vector<128x128xf32>
      %c0_11 = arith.constant 0 : index
      %c0_12 = arith.constant 0 : index
      %15 = vector.load %arg5[%c0_11, %c0_12] : memref<128x128xf32, #tpu.memory_space<vmem>>, vector<128x128xf32>
      tpu.vector_store %arg5[%c0_11, %c0_12], %14 {strides = array<i32>} : memref<128x128xf32, #tpu.memory_space<vmem>>, vector<128x128xf32>,
    } else {
    }
    %c0 = arith.constant 0 : index
    %c0_1 = arith.constant 0 : index
    %3 = vector.load %arg3[%c0, %c0_1] : memref<128x128xbf16, #tpu.memory_space<vmem>>, vector<128x128xbf16>
    %c0_2 = arith.constant 0 : index
    %c0_3 = arith.constant 0 : index
    %4 = vector.load %arg2[%c0_2, %c0_3] : memref<128x128xi8, #tpu.memory_space<vmem>>, vector<128x128xi8>
    %5 = arith.sitofp %4 : vector<128x128xi8> to vector<128x128xf32>
    %6 = arith.truncf %5 : vector<128x128xf32> to vector<128x128xbf16>
    %c0_4 = arith.constant 0 : index
    %c0_5 = arith.constant 0 : index
    %7 = vector.load %arg5[%c0_4, %c0_5] : memref<128x128xf32, #tpu.memory_space<vmem>>, vector<128x128xf32>
    %cst = arith.constant dense<0.000000e+00> : vector<128x128xf32>
    %8 = tpu.matmul %6, %3, %cst {dimension_numbers = #tpu.dot_dimension_numbers<[1], [0], [0], [1], [0, 0, 1, 1], [], []>} : vector<128x128xbf16>, vector<128x128xbf16>, vector<128x128xf32> -> vector<128x128xf32>
    %9 = arith.addf %7, %8 : vector<128x128xf32>
    %c0_6 = arith.constant 0 : index
    %c0_7 = arith.constant 0 : index
    %10 = vector.load %arg5[%c0_6, %c0_7] : memref<128x128xf32, #tpu.memory_space<vmem>>, vector<128x128xf32>
    tpu.vector_store %arg5[%c0_6, %c0_7], %9 {strides = array<i32>} : memref<128x128xf32, #tpu.memory_space<vmem>>, vector<128x128xf32>,
    %c0_i32_8 = arith.constant 0 : i32
    %11 = arith.cmpi eq, %arg1, %c0_i32_8 : i32
    %12 = arith.extui %11 : i1 to i32
    %c0_i32_9 = arith.constant 0 : i32
    %13 = arith.cmpi ne, %12, %c0_i32_9 : i32
    scf.if %13 {
      %c0_10 = arith.constant 0 : index
      %c0_11 = arith.constant 0 : index
      %14 = vector.load %arg5[%c0_10, %c0_11] : memref<128x128xf32, #tpu.memory_space<vmem>>, vector<128x128xf32>
      %c0_12 = arith.constant 0 : index
      %c0_13 = arith.constant 0 : index
      %15 = vector.load %arg4[%c0_12, %c0_13] : memref<128x1xf32, #tpu.memory_space<vmem>>, vector<128x1xf32>
      %16 = vector.broadcast %15 : vector<128x1xf32> to vector<128x128xf32>
      %17 = arith.mulf %14, %16 : vector<128x128xf32>
      %cst_14 = arith.constant 0.000000e+00 : f32
      %18 = vector.broadcast %cst_14 : f32 to vector<128x128xf32>
      %19 = arith.maximumf %17, %18 : vector<128x128xf32>
      %c0_15 = arith.constant 0 : index
      %c0_16 = arith.constant 0 : index
      %20 = vector.load %arg5[%c0_15, %c0_16] : memref<128x128xf32, #tpu.memory_space<vmem>>, vector<128x128xf32>
      tpu.vector_store %arg5[%c0_15, %c0_16], %19 {strides = array<i32>} : memref<128x128xf32, #tpu.memory_space<vmem>>, vector<128x128xf32>,
    } else {
    }
    return
  }
  func.func @transform_0(%arg0: i32, %arg1: i32) -> (i32, i32) {
    %c0_i32 = arith.constant 0 : i32
    return %arg0, %arg1 : i32, i32
  }
  func.func @transform_1(%arg0: i32, %arg1: i32) -> (i32, i32) {
    %c0_i32 = arith.constant 0 : i32
    %c0_i32_0 = arith.constant 0 : i32
    %c0_i32_1 = arith.constant 0 : i32
    return %c0_i32, %c0_i32_0 : i32, i32
  }
  func.func @transform_2(%arg0: i32, %arg1: i32) -> (i32, i32) {
    %c0_i32 = arith.constant 0 : i32
    %c0_i32_0 = arith.constant 0 : i32
    return %arg0, %c0_i32 : i32, i32
  }
  func.func @transform_3(%arg0: i32, %arg1: i32) -> (i32, i32) {
    %c0_i32 = arith.constant 0 : i32
    %c0_i32_0 = arith.constant 0 : i32
    return %arg0, %c0_i32 : i32, i32
  }
}

module attributes {stable_mosaic.version = 11 : i64} {
  func.func @project_kernel(%arg0: i32, %arg1: memref<128x32xf32, #tpu.memory_space<vmem>>, %arg2: memref<32x128xf32, #tpu.memory_space<vmem>>, %arg3: memref<128x1xf32, #tpu.memory_space<vmem>>, %arg4: memref<128x128xbf16, #tpu.memory_space<vmem>>) attributes {dimension_semantics = [#tpu.dimension_semantics<parallel>], iteration_bounds = array<i64: 1>, scalar_prefetch = 0 : i64, scratch_operands = 0 : i64, tpu.core_type = #tpu.core_type<tc>, window_params = [{transform_indices = @transform_0, window_bounds = array<i64: 128, 32>}, {pipeline_mode = #tpu.pipeline_mode<synchronous>, transform_indices = @transform_1, window_bounds = array<i64: 32, 128>}, {transform_indices = @transform_2, window_bounds = array<i64: 128, 1>}, {transform_indices = @transform_3, window_bounds = array<i64: 128, 128>}]} {
    %c0 = arith.constant 0 : index
    %c0_0 = arith.constant 0 : index
    %0 = vector.load %arg1[%c0, %c0_0] : memref<128x32xf32, #tpu.memory_space<vmem>>, vector<128x32xf32>
    %c0_1 = arith.constant 0 : index
    %c0_2 = arith.constant 0 : index
    %1 = vector.load %arg2[%c0_1, %c0_2] : memref<32x128xf32, #tpu.memory_space<vmem>>, vector<32x128xf32>
    %cst = arith.constant dense<0.000000e+00> : vector<128x128xf32>
    %2 = tpu.matmul %0, %1, %cst {dimension_numbers = #tpu.dot_dimension_numbers<[1], [0], [0], [1], [0, 0, 1, 1], [], []>} : vector<128x32xf32>, vector<32x128xf32>, vector<128x128xf32> -> vector<128x128xf32>
    %c0_3 = arith.constant 0 : index
    %c0_4 = arith.constant 0 : index
    %3 = vector.load %arg3[%c0_3, %c0_4] : memref<128x1xf32, #tpu.memory_space<vmem>>, vector<128x1xf32>
    %4 = vector.broadcast %3 : vector<128x1xf32> to vector<128x128xf32>
    %5 = arith.mulf %2, %4 : vector<128x128xf32>
    %6 = arith.truncf %5 : vector<128x128xf32> to vector<128x128xbf16>
    %c0_5 = arith.constant 0 : index
    %c0_6 = arith.constant 0 : index
    %7 = vector.load %arg4[%c0_5, %c0_6] : memref<128x128xbf16, #tpu.memory_space<vmem>>, vector<128x128xbf16>
    tpu.vector_store %arg4[%c0_5, %c0_6], %6 {strides = array<i32>} : memref<128x128xbf16, #tpu.memory_space<vmem>>, vector<128x128xbf16>,
    return
  }
  func.func @transform_0(%arg0: i32) -> (i32, i32) {
    %c0_i32 = arith.constant 0 : i32
    %c0_i32_0 = arith.constant 0 : i32
    return %arg0, %c0_i32 : i32, i32
  }
  func.func @transform_1(%arg0: i32) -> (i32, i32) {
    %c0_i32 = arith.constant 0 : i32
    %c0_i32_0 = arith.constant 0 : i32
    %c0_i32_1 = arith.constant 0 : i32
    return %c0_i32, %c0_i32_0 : i32, i32
  }
  func.func @transform_2(%arg0: i32) -> (i32, i32) {
    %c0_i32 = arith.constant 0 : i32
    %c0_i32_0 = arith.constant 0 : i32
    return %arg0, %c0_i32 : i32, i32
  }
  func.func @transform_3(%arg0: i32) -> (i32, i32) {
    %c0_i32 = arith.constant 0 : i32
    %c0_i32_0 = arith.constant 0 : i32
    return %arg0, %c0_i32 : i32, i32
  }
}

</mosaic_0001>

<bundles_post_ra>
// kernel: gcn_layer.2
= control target key start
LH: loop header
LB: loop body
LE: loop exit
PB: predicated region body
PF: predicated region fallthrough
CT: control target
= control target key end

     0   :  { %v375_v0 = vmov 0   ;;  %vm34_vm0 = vcmask 261120   ;;  %s544_s2 = inlined_call_operand.vmem [shape: f32[128,1], index: 2, kind: input, shape index: {}]   ;;  %s545_s1 = inlined_call_operand.vmem [shape: f32[32,128], index: 1, kind: input, shape index: {}]   ;;  %s546_s0 = inlined_call_operand.vmem [shape: f32[128,32], index: 0, kind: input, shape index: {}]   ;;  %s547_s3 = inlined_call_operand.vmem [shape: bf16[128,128], index: 3, kind: output, shape index: {}]  }
   0x1   :  { %373 = vset.pattern.permute.xlu1 %v375_v0  ;;  %372 = vset.pattern.permute.xlu0 %v375_v0  ;;  %v150_v1 = vld [vmem:[%s544_s2 + $0x10] sm:$0xff]  ;;  %v148_v2 = vld [vmem:[%s544_s2] sm:$0xff]  ;;  %v33_v3 = vld [vmem:[%s545_s1 + $0x18] sm:$0xff] }
   0x2   :  { %176 = vperm.xlu1 %373, %v150_v1   ;;  %166 = vperm.xlu0 %372, %v148_v2   ;;  %v32_v4 = vld [vmem:[%s545_s1 + $0x10] sm:$0xff]  ;;  %v31_v5 = vld [vmem:[%s545_s1 + $0x8] sm:$0xff]  ;;  %v30_v6 = vld [vmem:[%s545_s1] sm:$0xff] }
   0x3   :  { %95 = vmatpush.msra.mxu0 %v33_v3  ;;  %359 = vmatpush.msra.mxu1 %v33_v3  ;;  %v14_v7 = vld [vmem:[%s546_s0] sm:$0xff]  ;;  %v151_v12 = vld [vmem:[%s544_s2 + $0x18] sm:$0xff]  ;;  %v149_v13 = vld [vmem:[%s544_s2 + $0x8] sm:$0xff] }
   0x4   :  { %360 = vmatpush.msra.mxu2 %v33_v3  ;;  %361 = vmatpush.msra.mxu3 %v33_v3  ;;  %v18_v8 = vld [vmem:[%s546_s0 + $0x20] sm:$0xff]  ;;  %v15_v14 = vld [vmem:[%s546_s0 + $0x8] sm:$0xff]  ;;  %v155_v19 = vld [vmem:[%s544_s2 + $0x38] sm:$0xff] }
   0x5   :  { %96 = vmatpush.msra.mxu0 %v32_v4  ;;  %362 = vmatpush.msra.mxu1 %v32_v4  ;;  %v22_v9 = vld [vmem:[%s546_s0 + $0x40] sm:$0xff]  ;;  %v19_v15 = vld [vmem:[%s546_s0 + $0x28] sm:$0xff]  ;;  %v154_v20 = vld [vmem:[%s544_s2 + $0x30] sm:$0xff] }
   0x6   :  { %363 = vmatpush.msra.mxu2 %v32_v4  ;;  %364 = vmatpush.msra.mxu3 %v32_v4  ;;  %v26_v10 = vld [vmem:[%s546_s0 + $0x60] sm:$0xff]  ;;  %v23_v16 = vld [vmem:[%s546_s0 + $0x48] sm:$0xff]  ;;  %v16_v21 = vld [vmem:[%s546_s0 + $0x10] sm:$0xff] }
   0x7   :  { %97 = vmatpush.msra.mxu0 %v31_v5  ;;  %365 = vmatpush.msra.mxu1 %v31_v5  ;;  %v152_v11 = vld [vmem:[%s544_s2 + $0x20] sm:$0xff]  ;;  %v27_v17 = vld [vmem:[%s546_s0 + $0x68] sm:$0xff]  ;;  %v20_v22 = vld [vmem:[%s546_s0 + $0x30] sm:$0xff] }
   0x8   :  { %366 = vmatpush.msra.mxu2 %v31_v5  ;;  %367 = vmatpush.msra.mxu3 %v31_v5  ;;  %v153_v18 = vld [vmem:[%s544_s2 + $0x28] sm:$0xff]  ;;  %v24_v23 = vld [vmem:[%s546_s0 + $0x50] sm:$0xff]  ;;  %v156_v25 = vld [vmem:[%s544_s2 + $0x40] sm:$0xff] }
   0x9   :  { %98 = vmatpush.msra.mxu0 %v30_v6  ;;  %368 = vmatpush.msra.mxu1 %v30_v6  ;;  %v28_v24 = vld [vmem:[%s546_s0 + $0x70] sm:$0xff]  ;;  %v157_v27 = vld [vmem:[%s544_s2 + $0x48] sm:$0xff]  ;;  %v17_v28 = vld [vmem:[%s546_s0 + $0x18] sm:$0xff] }
   0xa   :  { %369 = vmatpush.msra.mxu2 %v30_v6  ;;  %370 = vmatpush.msra.mxu3 %v30_v6  ;;  %v158_v26 = vld [vmem:[%s544_s2 + $0x50] sm:$0xff]  ;;  %v21_v29 = vld [vmem:[%s546_s0 + $0x38] sm:$0xff]  ;;  %v161_v33 = vld [vmem:[%s544_s2 + $0x68] sm:$0xff] }
   0xb   :  { %374 = vset.pattern.permute.xlu2 %v375_v0  ;;  %296 = vmatmul.msk.f32.vlgmr.msra.gmra.mxu0 %vm34_vm0, %v14_v7  ;;  %v25_v30 = vld [vmem:[%s546_s0 + $0x58] sm:$0xff]  ;;  %v160_v34 = vld [vmem:[%s544_s2 + $0x60] sm:$0xff]  ;;  %v162_v35 = vld [vmem:[%s544_s2 + $0x70] sm:$0xff] }
   0xc   :  { %300 = vmatmul.msk.f32.vlgmr.msra.gmra.mxu1 %vm34_vm0, %v18_v8  ;;  %304 = vmatmul.msk.f32.vlgmr.msra.gmra.mxu2 %vm34_vm0, %v22_v9  ;;  %v29_v31 = vld [vmem:[%s546_s0 + $0x78] sm:$0xff] }
   0xd   :  { %308 = vmatmul.msk.f32.vlgmr.msra.gmra.mxu3 %vm34_vm0, %v26_v10  ;;  %186 = vperm.xlu2 %374, %v152_v11   ;;  %v159_v32 = vld [vmem:[%s544_s2 + $0x58] sm:$0xff] }
   0xe   :  { %181 = vperm.xlu1 %373, %v151_v12   ;;  %171 = vperm.xlu0 %372, %v149_v13   ;;  %v163_v36 = vld [vmem:[%s544_s2 + $0x78] sm:$0xff] }
  0x13   :  { %297 = vmatmul.msk.f32.gmra.mxu0 %vm34_vm0, %v15_v14 }
  0x14   :  { %301 = vmatmul.msk.f32.gmra.mxu1 %vm34_vm0, %v19_v15  ;;  %305 = vmatmul.msk.f32.gmra.mxu2 %vm34_vm0, %v23_v16 }
  0x15   :  { %309 = vmatmul.msk.f32.gmra.mxu3 %vm34_vm0, %v27_v17  ;;  %191 = vperm.xlu2 %374, %v153_v18  }
  0x16   :  { %201 = vperm.xlu1 %373, %v155_v19   ;;  %196 = vperm.xlu0 %372, %v154_v20  }
  0x1b   :  { %298 = vmatmul.msk.f32.gmra.mxu0 %vm34_vm0, %v16_v21 }
  0x1c   :  { %302 = vmatmul.msk.f32.gmra.mxu1 %vm34_vm0, %v20_v22  ;;  %306 = vmatmul.msk.f32.gmra.mxu2 %vm34_vm0, %v24_v23 }
  0x1d   :  { %310 = vmatmul.msk.f32.gmra.mxu3 %vm34_vm0, %v28_v24  ;;  %206 = vperm.xlu2 %374, %v156_v25  }
  0x1e   :  { %216 = vperm.xlu1 %373, %v158_v26   ;;  %211 = vperm.xlu0 %372, %v157_v27  }
  0x23   :  { %299 = vmatmul.msk.f32.gmra.mxu0 %vm34_vm0, %v17_v28 }
  0x24   :  { %303 = vmatmul.msk.f32.gmra.mxu1 %vm34_vm0, %v21_v29  ;;  %307 = vmatmul.msk.f32.gmra.mxu2 %vm34_vm0, %v25_v30 }
  0x25   :  { %311 = vmatmul.msk.f32.gmra.mxu3 %vm34_vm0, %v29_v31  ;;  %221 = vperm.xlu2 %374, %v159_v32  }
  0x26   :  { %231 = vperm.xlu1 %373, %v161_v33   ;;  %226 = vperm.xlu0 %372, %v160_v34  }
  0x2d   :  { %236 = vperm.xlu2 %374, %v162_v35  }
  0x2e   :  { %241 = vperm.xlu0 %372, %v163_v36  }
  0x67   :  { %v187_v39 = vpop.permute.xlu2 %186 }
  0x6f   :  { %v192_v46 = vpop.permute.xlu2 %191 }
  0x74   :  { %v177_v37 = vpop.permute.xlu1 %176  ;;  %v167_v38 = vpop.permute.xlu0 %166 }
  0x77   :  { %v207_v57 = vpop.permute.xlu2 %206 }
  0x7f   :  { %v222_v8 = vpop.permute.xlu2 %221 }
  0x80   :  { %v182_v40 = vpop.permute.xlu1 %181  ;;  %v172_v41 = vpop.permute.xlu0 %171 }
  0x87   :  { %v237_v20 = vpop.permute.xlu2 %236 }
  0x88   :  { %v202_v42 = vpop.permute.xlu1 %201  ;;  %v197_v43 = vpop.permute.xlu0 %196 }
  0x89   :  { %v100_v44 = vpop.f32.mrf.mxu0  ;;  %v112_v45 = vpop.f32.mrf.mxu1 }
  0x8a   :  { %v244_v52 = vmul.f32 %v167_v38, %v100_v44  ;;  %v248_v55 = vmul.f32 %v187_v39, %v112_v45 }
  0x8f   :  { %v124_v47 = vpop.f32.mrf.mxu2 }
  0x90   :  { %v217_v48 = vpop.permute.xlu1 %216  ;;  %v212_v49 = vpop.permute.xlu0 %211  ;;  %v252_v61 = vmul.f32 %v207_v57, %v124_v47 }
  0x91   :  { %v136_v50 = vpop.f32.mrf.mxu3  ;;  %v103_v51 = vpop.f32.mrf.mxu0 }
  0x92   :  { %v245_v53 = vmul.f32 %v172_v41, %v103_v51  ;;  %v115_v54 = vpop.f32.mrf.mxu1 }
  0x93   :  { %v249_v56 = vmul.f32 %v192_v46, %v115_v54 }
  0x94   :  { %v315_v58 = vpack.c.bf16 %v245_v53, %v244_v52 }
  0x95   :  { %v325_v59 = vpack.c.bf16 %v249_v56, %v248_v55 }
  0x96   :  { %316 = vst [vmem:[%s547_s3] sm:$0xff] %v315_v58  }
  0x97   :  { %353 = vst [vmem:[%s547_s3 + $0x10] sm:$0xff] %v325_v59   ;;  %v127_v60 = vpop.f32.mrf.mxu2 }
  0x98   :  { %v232_v62 = vpop.permute.xlu1 %231  ;;  %v227_v63 = vpop.permute.xlu0 %226  ;;  %v253_v0 = vmul.f32 %v212_v49, %v127_v60 }
  0x99   :  { %v256_v1 = vmul.f32 %v227_v63, %v136_v50  ;;  %v139_v2 = vpop.f32.mrf.mxu3  ;;  %v106_v3 = vpop.f32.mrf.mxu0 }
  0x9a   :  { %v335_v4 = vpack.c.bf16 %v253_v0, %v252_v61  ;;  %v257_v5 = vmul.f32 %v232_v62, %v139_v2  ;;  %v118_v6 = vpop.f32.mrf.mxu1  ;;  %v246_v12 = vmul.f32 %v177_v37, %v106_v3 }
  0x9b   :  { %v250_v15 = vmul.f32 %v197_v43, %v118_v6 }
  0x9c   :  { %355 = vst [vmem:[%s547_s3 + $0x20] sm:$0xff] %v335_v4   ;;  %v345_v7 = vpack.c.bf16 %v257_v5, %v256_v1 }
  0x9e   :  { %357 = vst [vmem:[%s547_s3 + $0x30] sm:$0xff] %v345_v7  }
  0x9f   :  { %v130_v9 = vpop.f32.mrf.mxu2 }
  0xa0   :  { %v254_v21 = vmul.f32 %v217_v48, %v130_v9  ;;  %v242_v23 = vpop.permute.xlu0 %241 }
  0xa1   :  { %v142_v10 = vpop.f32.mrf.mxu3  ;;  %v109_v11 = vpop.f32.mrf.mxu0 }
  0xa2   :  { %v247_v13 = vmul.f32 %v182_v40, %v109_v11  ;;  %v121_v14 = vpop.f32.mrf.mxu1  ;;  %v258_v25 = vmul.f32 %v237_v20, %v142_v10 }
  0xa3   :  { %v251_v16 = vmul.f32 %v202_v42, %v121_v14 }
  0xa4   :  { %v320_v17 = vpack.c.bf16 %v247_v13, %v246_v12 }
  0xa5   :  { %v330_v18 = vpack.c.bf16 %v251_v16, %v250_v15 }
  0xa6   :  { %352 = vst [vmem:[%s547_s3 + $0x8] sm:$0xff] %v320_v17  }
  0xa7   :  { %354 = vst [vmem:[%s547_s3 + $0x18] sm:$0xff] %v330_v18   ;;  %v133_v19 = vpop.f32.mrf.mxu2 }
  0xa8   :  { %v255_v22 = vmul.f32 %v222_v8, %v133_v19 }
  0xa9   :  { %v145_v24 = vpop.f32.mrf.mxu3 }
  0xaa   :  { %v340_v26 = vpack.c.bf16 %v255_v22, %v254_v21  ;;  %v259_v27 = vmul.f32 %v242_v23, %v145_v24 }
  0xac   :  { %356 = vst [vmem:[%s547_s3 + $0x28] sm:$0xff] %v340_v26   ;;  %v350_v28 = vpack.c.bf16 %v259_v27, %v258_v25 }
  0xae   :  { %358 = vst [vmem:[%s547_s3 + $0x38] sm:$0xff] %v350_v28  }

// kernel: gcn_layer.3
= control target key start
LH: loop header
LB: loop body
LE: loop exit
PB: predicated region body
PF: predicated region fallthrough
CT: control target
= control target key end

     0   :  { %v475_v1 = vmov 0   ;;  %s652_s1 = inlined_call_operand.vmem [shape: bf16[128,128], index: 1, kind: input, shape index: {}]   ;;  %s653_s2 = inlined_call_operand.vmem [shape: f32[128,1], index: 2, kind: input, shape index: {}]   ;;  %s654_s0 = inlined_call_operand.vmem [shape: s8[128,128], index: 0, kind: input, shape index: {}]   ;;  %s655_s3 = inlined_call_operand.vmem [shape: f32[128,128], index: 3, kind: output, shape index: {}]  }
   0x1   :  { %v445_v0 = vld [vmem:[%s652_s1 + $0x38] sm:$0xff]  ;;  %472 = vset.pattern.permute.xlu0 %v475_v1  ;;  %v258_v2 = vld [vmem:[%s653_s2] sm:$0xff]  ;;  %473 = vset.pattern.permute.xlu1 %v475_v1  ;;  %v444_v3 = vld [vmem:[%s652_s1 + $0x30] sm:$0xff] }
   0x2   :  { %276 = vperm.xlu0 %472, %v258_v2   ;;  %474 = vset.pattern.permute.xlu2 %v475_v1  ;;  %v260_v4 = vld [vmem:[%s653_s2 + $0x10] sm:$0xff]  ;;  %v443_v5 = vld [vmem:[%s652_s1 + $0x28] sm:$0xff]  ;;  %v262_v7 = vld [vmem:[%s653_s2 + $0x20] sm:$0xff] }
   0x3   :  { %158 = vmatpush.bf16.msra.mxu0 %v445_v0  ;;  %446 = vmatpush.bf16.msra.mxu1 %v445_v0  ;;  %v259_v6 = vld [vmem:[%s653_s2 + $0x8] sm:$0xff]  ;;  %v261_v8 = vld [vmem:[%s653_s2 + $0x18] sm:$0xff]  ;;  %v442_v9 = vld [vmem:[%s652_s1 + $0x20] sm:$0xff] }
   0x4   :  { %447 = vmatpush.bf16.msra.mxu2 %v445_v0  ;;  %448 = vmatpush.bf16.msra.mxu3 %v445_v0  ;;  %v263_v10 = vld [vmem:[%s653_s2 + $0x28] sm:$0xff]  ;;  %v441_v11 = vld [vmem:[%s652_s1 + $0x18] sm:$0xff]  ;;  %v264_v12 = vld [vmem:[%s653_s2 + $0x30] sm:$0xff] }
   0x5   :  { %286 = vperm.xlu1 %473, %v260_v4   ;;  %296 = vperm.xlu2 %474, %v262_v7   ;;  %v265_v13 = vld [vmem:[%s653_s2 + $0x38] sm:$0xff]  ;;  %v440_v14 = vld [vmem:[%s652_s1 + $0x10] sm:$0xff]  ;;  %v541_v15 = vld [vmem:[%s654_s0] sm:$0xff] }
   0x6   :  { %v546_v16 = vld [vmem:[%s654_s0 + $0x8] sm:$0xff]  ;;  %v551_v17 = vld [vmem:[%s654_s0 + $0x10] sm:$0xff]  ;;  %v556_v18 = vld [vmem:[%s654_s0 + $0x18] sm:$0xff]  ;;  %v54_v19 = vunpack.c.0.s8 %v541_v15  ;;  %v55_v20 = vunpack.c.1.s8 %v541_v15  ;;  %v56_v47 = vunpack.c.2.s8 %v541_v15  ;;  %v57_v48 = vunpack.c.3.s8 %v541_v15 }
   0x7   :  { %159 = vmatpush.bf16.msra.mxu0 %v444_v3  ;;  %449 = vmatpush.bf16.msra.mxu1 %v444_v3  ;;  %v58_v21 = vunpack.c.0.s8 %v546_v16  ;;  %v59_v22 = vunpack.c.1.s8 %v546_v16  ;;  %v266_v23 = vld [vmem:[%s653_s2 + $0x40] sm:$0xff]  ;;  %v439_v24 = vld [vmem:[%s652_s1 + $0x8] sm:$0xff]  ;;  %v62_v26 = vunpack.c.0.s8 %v551_v17  ;;  %v63_v27 = vunpack.c.1.s8 %v551_v17  ;;  %v268_v34 = vld [vmem:[%s653_s2 + $0x50] sm:$0xff] }
   0x8   :  { %450 = vmatpush.bf16.msra.mxu2 %v444_v3  ;;  %451 = vmatpush.bf16.msra.mxu3 %v444_v3  ;;  %v267_v25 = vld [vmem:[%s653_s2 + $0x48] sm:$0xff]  ;;  %v66_v28 = vunpack.c.0.s8 %v556_v18  ;;  %v67_v29 = vunpack.c.1.s8 %v556_v18  ;;  %v70_v30 = vcvt.s32.f32 %v54_v19  ;;  %v71_v31 = vcvt.s32.f32 %v55_v20  ;;  %v438_v35 = vld [vmem:[%s652_s1] sm:$0xff]  ;;  %v269_v42 = vld [vmem:[%s653_s2 + $0x58] sm:$0xff] }
   0x9   :  { %v74_v32 = vcvt.s32.f32 %v58_v21  ;;  %v75_v33 = vcvt.s32.f32 %v59_v22  ;;  %v78_v36 = vcvt.s32.f32 %v62_v26  ;;  %v79_v37 = vcvt.s32.f32 %v63_v27  ;;  %v270_v45 = vld [vmem:[%s653_s2 + $0x60] sm:$0xff]  ;;  %v271_v46 = vld [vmem:[%s653_s2 + $0x68] sm:$0xff]  ;;  %v272_v51 = vld [vmem:[%s653_s2 + $0x70] sm:$0xff] }
   0xa   :  { %281 = vperm.xlu0 %472, %v259_v6   ;;  %v82_v38 = vcvt.s32.f32 %v66_v28  ;;  %v83_v39 = vcvt.s32.f32 %v67_v29  ;;  %v86_v40 = vpack.c.bf16 %v71_v31, %v70_v30  ;;  %v60_v49 = vunpack.c.2.s8 %v546_v16  ;;  %v273_v56 = vld [vmem:[%s653_s2 + $0x78] sm:$0xff] }
   0xb   :  { %160 = vmatpush.bf16.msra.mxu0 %v443_v5  ;;  %452 = vmatpush.bf16.msra.mxu1 %v443_v5  ;;  %v88_v41 = vpack.c.bf16 %v75_v33, %v74_v32  ;;  %v90_v43 = vpack.c.bf16 %v79_v37, %v78_v36  ;;  %v61_v50 = vunpack.c.3.s8 %v546_v16  ;;  %v64_v52 = vunpack.c.2.s8 %v551_v17 }
   0xc   :  { %453 = vmatpush.bf16.msra.mxu2 %v443_v5  ;;  %454 = vmatpush.bf16.msra.mxu3 %v443_v5  ;;  %v92_v44 = vpack.c.bf16 %v83_v39, %v82_v38  ;;  %v65_v53 = vunpack.c.3.s8 %v551_v17  ;;  %v68_v54 = vunpack.c.2.s8 %v556_v18  ;;  %v69_v55 = vunpack.c.3.s8 %v556_v18 }
   0xd   :  { %291 = vperm.xlu1 %473, %v261_v8   ;;  %301 = vperm.xlu2 %474, %v263_v10   ;;  %v72_v57 = vcvt.s32.f32 %v56_v47  ;;  %v73_v58 = vcvt.s32.f32 %v57_v48  ;;  %v76_v59 = vcvt.s32.f32 %v60_v49  ;;  %v77_v60 = vcvt.s32.f32 %v61_v50 }
   0xe   :  { %v80_v61 = vcvt.s32.f32 %v64_v52  ;;  %v81_v62 = vcvt.s32.f32 %v65_v53  ;;  %v84_v63 = vcvt.s32.f32 %v68_v54  ;;  %v85_v0 = vcvt.s32.f32 %v69_v55 }
   0xf   :  { %161 = vmatpush.bf16.msra.mxu0 %v442_v9  ;;  %455 = vmatpush.bf16.msra.mxu1 %v442_v9  ;;  %v87_v1 = vpack.c.bf16 %v73_v58, %v72_v57  ;;  %v89_v2 = vpack.c.bf16 %v77_v60, %v76_v59 }
  0x10   :  { %456 = vmatpush.bf16.msra.mxu2 %v442_v9  ;;  %457 = vmatpush.bf16.msra.mxu3 %v442_v9  ;;  %v91_v3 = vpack.c.bf16 %v81_v62, %v80_v61  ;;  %v93_v4 = vpack.c.bf16 %v85_v0, %v84_v63 }
  0x12   :  { %306 = vperm.xlu0 %472, %v264_v12  }
  0x13   :  { %162 = vmatpush.bf16.msra.mxu0 %v441_v11  ;;  %458 = vmatpush.bf16.msra.mxu1 %v441_v11 }
  0x14   :  { %459 = vmatpush.bf16.msra.mxu2 %v441_v11  ;;  %460 = vmatpush.bf16.msra.mxu3 %v441_v11 }
  0x15   :  { %311 = vperm.xlu1 %473, %v265_v13   ;;  %316 = vperm.xlu2 %474, %v266_v23  }
  0x17   :  { %163 = vmatpush.bf16.msra.mxu0 %v440_v14  ;;  %461 = vmatpush.bf16.msra.mxu1 %v440_v14 }
  0x18   :  { %462 = vmatpush.bf16.msra.mxu2 %v440_v14  ;;  %463 = vmatpush.bf16.msra.mxu3 %v440_v14 }
  0x1a   :  { %321 = vperm.xlu0 %472, %v267_v25  }
  0x1b   :  { %164 = vmatpush.bf16.msra.mxu0 %v439_v24  ;;  %464 = vmatpush.bf16.msra.mxu1 %v439_v24 }
  0x1c   :  { %465 = vmatpush.bf16.msra.mxu2 %v439_v24  ;;  %466 = vmatpush.bf16.msra.mxu3 %v439_v24 }
  0x1d   :  { %326 = vperm.xlu1 %473, %v268_v34   ;;  %331 = vperm.xlu2 %474, %v269_v42  }
  0x1f   :  { %165 = vmatpush.bf16.msra.mxu0 %v438_v35  ;;  %467 = vmatpush.bf16.msra.mxu1 %v438_v35 }
  0x20   :  { %468 = vmatpush.bf16.msra.mxu2 %v438_v35  ;;  %469 = vmatpush.bf16.msra.mxu3 %v438_v35 }
  0x22   :  { %166 = vmatmul.bf16.vlgmr.msra.gmra.mxu0 %v86_v40  ;;  %176 = vmatmul.bf16.vlgmr.msra.gmra.mxu1 %v88_v41 }
  0x23   :  { %186 = vmatmul.bf16.vlgmr.msra.gmra.mxu2 %v90_v43  ;;  %196 = vmatmul.bf16.vlgmr.msra.gmra.mxu3 %v92_v44 }
  0x24   :  { %336 = vperm.xlu0 %472, %v270_v45  }
  0x25   :  { %341 = vperm.xlu1 %473, %v271_v46   ;;  %346 = vperm.xlu2 %474, %v272_v51  }
  0x2c   :  { %351 = vperm.xlu0 %472, %v273_v56  }
  0x32   :  { %171 = vmatmul.bf16.gmra.mxu0 %v87_v1  ;;  %181 = vmatmul.bf16.gmra.mxu1 %v89_v2 }
  0x33   :  { %191 = vmatmul.bf16.gmra.mxu2 %v91_v3  ;;  %201 = vmatmul.bf16.gmra.mxu3 %v93_v4 }
  0x5f   :  { %v297_v8 = vpop.permute.xlu2 %296 }
  0x67   :  { %v302_v11 = vpop.permute.xlu2 %301 }
  0x6f   :  { %v317_v18 = vpop.permute.xlu2 %316 }
  0x74   :  { %v277_v5 = vpop.permute.xlu0 %276 }
  0x77   :  { %v287_v6 = vpop.permute.xlu1 %286  ;;  %v332_v35 = vpop.permute.xlu2 %331 }
  0x7c   :  { %v282_v7 = vpop.permute.xlu0 %281 }
  0x7f   :  { %v292_v9 = vpop.permute.xlu1 %291  ;;  %v347_v53 = vpop.permute.xlu2 %346 }
  0x84   :  { %v307_v10 = vpop.permute.xlu0 %306 }
  0x87   :  { %v312_v12 = vpop.permute.xlu1 %311 }
  0x8c   :  { %v322_v13 = vpop.permute.xlu0 %321 }
  0x8f   :  { %v327_v21 = vpop.permute.xlu1 %326 }
  0x96   :  { %v337_v26 = vpop.permute.xlu0 %336 }
  0x97   :  { %v342_v40 = vpop.permute.xlu1 %341 }
  0x9e   :  { %v352_v0 = vpop.permute.xlu0 %351 }
  0x9f   :  { %v167_v14 = vpop.f32.mrf.mxu0  ;;  %v177_v15 = vpop.f32.mrf.mxu1 }
  0xa0   :  { %v354_v16 = vmul.f32 %v277_v5, %v167_v14  ;;  %v358_v17 = vmul.f32 %v297_v8, %v177_v15 }
  0xa2   :  { %v370_v19 = vmax.f32 %v354_v16, 0.0  ;;  %v374_v20 = vmax.f32 %v358_v17, 0.0 }
  0xa4   :  { %386 = vst [vmem:[%s655_s3] sm:$0xff] %v370_v19 }
  0xa5   :  { %390 = vst [vmem:[%s655_s3 + $0x20] sm:$0xff] %v374_v20 }
  0xa6   :  { %v187_v22 = vpop.f32.mrf.mxu2  ;;  %v197_v23 = vpop.f32.mrf.mxu3 }
  0xa7   :  { %v169_v24 = vpop.f32.mrf.mxu0  ;;  %v179_v25 = vpop.f32.mrf.mxu1  ;;  %v362_v27 = vmul.f32 %v317_v18, %v187_v22  ;;  %v366_v28 = vmul.f32 %v337_v26, %v197_v23 }
  0xa8   :  { %v355_v29 = vmul.f32 %v282_v7, %v169_v24  ;;  %v359_v30 = vmul.f32 %v302_v11, %v179_v25 }
  0xa9   :  { %v378_v31 = vmax.f32 %v362_v27, 0.0  ;;  %v382_v32 = vmax.f32 %v366_v28, 0.0 }
  0xaa   :  { %v371_v33 = vmax.f32 %v355_v29, 0.0  ;;  %v375_v34 = vmax.f32 %v359_v30, 0.0 }
  0xab   :  { %394 = vst [vmem:[%s655_s3 + $0x40] sm:$0xff] %v378_v31 }
  0xac   :  { %398 = vst [vmem:[%s655_s3 + $0x60] sm:$0xff] %v382_v32 }
  0xad   :  { %387 = vst [vmem:[%s655_s3 + $0x8] sm:$0xff] %v371_v33 }
  0xae   :  { %v189_v36 = vpop.f32.mrf.mxu2  ;;  %v199_v37 = vpop.f32.mrf.mxu3  ;;  %391 = vst [vmem:[%s655_s3 + $0x28] sm:$0xff] %v375_v34 }
  0xaf   :  { %v172_v38 = vpop.f32.mrf.mxu0  ;;  %v182_v39 = vpop.f32.mrf.mxu1  ;;  %v363_v41 = vmul.f32 %v322_v13, %v189_v36  ;;  %v367_v42 = vmul.f32 %v342_v40, %v199_v37 }
  0xb0   :  { %v356_v43 = vmul.f32 %v287_v6, %v172_v38  ;;  %v360_v44 = vmul.f32 %v307_v10, %v182_v39 }
  0xb1   :  { %v379_v45 = vmax.f32 %v363_v41, 0.0  ;;  %v383_v46 = vmax.f32 %v367_v42, 0.0 }
  0xb2   :  { %v372_v47 = vmax.f32 %v356_v43, 0.0  ;;  %v376_v48 = vmax.f32 %v360_v44, 0.0 }
  0xb3   :  { %395 = vst [vmem:[%s655_s3 + $0x48] sm:$0xff] %v379_v45 }
  0xb4   :  { %399 = vst [vmem:[%s655_s3 + $0x68] sm:$0xff] %v383_v46 }
  0xb5   :  { %388 = vst [vmem:[%s655_s3 + $0x10] sm:$0xff] %v372_v47 }
  0xb6   :  { %v192_v49 = vpop.f32.mrf.mxu2  ;;  %v202_v50 = vpop.f32.mrf.mxu3  ;;  %392 = vst [vmem:[%s655_s3 + $0x30] sm:$0xff] %v376_v48 }
  0xb7   :  { %v174_v51 = vpop.f32.mrf.mxu0  ;;  %v184_v52 = vpop.f32.mrf.mxu1  ;;  %v364_v54 = vmul.f32 %v327_v21, %v192_v49  ;;  %v368_v55 = vmul.f32 %v347_v53, %v202_v50 }
  0xb8   :  { %v357_v56 = vmul.f32 %v292_v9, %v174_v51  ;;  %v361_v57 = vmul.f32 %v312_v12, %v184_v52 }
  0xb9   :  { %v380_v58 = vmax.f32 %v364_v54, 0.0  ;;  %v384_v59 = vmax.f32 %v368_v55, 0.0 }
  0xba   :  { %v373_v60 = vmax.f32 %v357_v56, 0.0  ;;  %v377_v61 = vmax.f32 %v361_v57, 0.0 }
  0xbb   :  { %396 = vst [vmem:[%s655_s3 + $0x50] sm:$0xff] %v380_v58 }
  0xbc   :  { %400 = vst [vmem:[%s655_s3 + $0x70] sm:$0xff] %v384_v59 }
  0xbd   :  { %389 = vst [vmem:[%s655_s3 + $0x18] sm:$0xff] %v373_v60 }
  0xbe   :  { %v194_v62 = vpop.f32.mrf.mxu2  ;;  %v204_v63 = vpop.f32.mrf.mxu3  ;;  %393 = vst [vmem:[%s655_s3 + $0x38] sm:$0xff] %v377_v61 }
  0xbf   :  { %v365_v1 = vmul.f32 %v332_v35, %v194_v62  ;;  %v369_v2 = vmul.f32 %v352_v0, %v204_v63 }
  0xc1   :  { %v381_v3 = vmax.f32 %v365_v1, 0.0  ;;  %v385_v4 = vmax.f32 %v369_v2, 0.0 }
  0xc3   :  { %397 = vst [vmem:[%s655_s3 + $0x58] sm:$0xff] %v381_v3 }
  0xc4   :  { %401 = vst [vmem:[%s655_s3 + $0x78] sm:$0xff] %v385_v4 }

</bundles_post_ra>
